<compile_context>
chip_gen: v6e
topology: v6e:2x2x1
jax: 0.10.0
libtpu: 0.0.40
codegen_flags: <defaults>
</compile_context>

<pallas_src>
import numpy as np
import jax
import jax.numpy as jnp
from jax import lax
from jax.experimental import pallas as pl
from jax.experimental.pallas import tpu as pltpu

HIDDEN = 256
POOL_H, POOL_W = 11, 16
KSIZE, STRIDE, PAD = 3, 2, 1
LANE = 128
SUB = 8


# ----------------------------------------------------------------------------
# Trace-time constants (shape-only, no data dependence)
# ----------------------------------------------------------------------------
def adaptive_pool_matrix(in_size, out_size):
    """P[i, j] = 1/len(bin_i) for j in adaptive-avg-pool bin i (PyTorch rule)."""
    P = np.zeros((out_size, in_size), np.float32)
    for i in range(out_size):
        s = (i * in_size) // out_size
        e = ((i + 1) * in_size + out_size - 1) // out_size  # ceil
        P[i, s:e] = 1.0 / (e - s)
    return P


def conv_selection_matrices(in_size, pool_out, k, stride, pad):
    """M[kk] = (strided tap kk) @ (zero pad) @ (adaptive pool), shape (conv_out, in_size)."""
    conv_out = (pool_out + 2 * pad - k) // stride + 1
    P = adaptive_pool_matrix(in_size, pool_out)
    Padm = np.zeros((pool_out + 2 * pad, pool_out), np.float32)
    for r in range(pool_out):
        Padm[r + pad, r] = 1.0
    mats = []
    for kk in range(k):
        S = np.zeros((conv_out, pool_out + 2 * pad), np.float32)
        for i in range(conv_out):
            S[i, stride * i + kk] = 1.0
        mats.append(S @ Padm @ P)
    return np.stack(mats), conv_out


def _vmem_budget_bytes():
    """Per-generation VMEM budget: ~89 MiB on 128 MiB parts, ~40 MiB on v7x (64 MiB)."""
    try:
        cap = int(pltpu.get_tpu_info().vmem_capacity_bytes)
    except Exception:
        cap = 64 << 20  # conservative (v7x-sized) fallback
    return max(min(cap - (24 << 20), int(0.7 * cap)), 16 << 20)


def _default_use_fold():
    """Folded-matmul path everywhere except v5e (would exceed its compute roofline)."""
    try:
        kind = jax.devices()[0].device_kind.lower()
    except Exception:
        return True
    is_v5e = ("v5e" in kind) or ("v5 lite" in kind) or ("v5lite" in kind)
    return not is_v5e


def _pick_batch_tile(n_pad, per_row_bytes, avail_bytes, min_steps=2):
    """Largest multiple-of-8 divisor of n_pad fitting the VMEM row budget; keeps >= min_steps
    grid steps when possible (v7x 2-TC sharding + pipeline overlap)."""
    if n_pad <= SUB:
        return n_pad
    cands = [t for t in range(SUB, n_pad + 1, SUB) if n_pad % t == 0]
    multi = [t for t in cands if n_pad // t >= min_steps]
    if multi:
        cands = multi
    fit = [t for t in cands if t * per_row_bytes <= avail_bytes]
    return max(fit) if fit else min(cands)


def _fold_constants(params, C, H, W):
    """A (C, H*W) folded pool+dwconv+GAP map; Wc (C,256) = w_pw.T@w1.T; bc = b_pw@w1.T + b1."""
    HW = H * W
    M_H, ho = conv_selection_matrices(H, POOL_H, KSIZE, STRIDE, PAD)
    M_W, wo = conv_selection_matrices(W, POOL_W, KSIZE, STRIDE, PAD)
    uh = jnp.asarray(M_H.sum(axis=1))                          # (3, H)
    vw = jnp.asarray(M_W.sum(axis=1))                          # (3, W)
    wdw = params['w_dw'].reshape(C, KSIZE, KSIZE).astype(jnp.float32)
    amap = jnp.einsum('ckl,kh,lw->chw', wdw, uh, vw,
                      precision=lax.Precision.HIGHEST) / float(ho * wo)
    amap = amap.reshape(C, HW)
    # pointwise 1x1 conv and Linear1 are back-to-back linear maps -> merge at trace time
    wc = jnp.einsum('oc,jo->cj', params['w_pw'], params['w1'],
                    precision=lax.Precision.HIGHEST)           # (C, 256)
    bc = jnp.einsum('o,jo->j', params['b_pw'], params['w1'],
                    precision=lax.Precision.HIGHEST) + params['b1']
    return amap, wc, bc


# ----------------------------------------------------------------------------
# Pallas kernels
# ----------------------------------------------------------------------------
def classifier_fold_kernel(x_ref, bmat_ref, bcomb_ref, w2_ref, b2_ref, out_ref):
    # x_ref: (tile_n, C*HW) bf16; bmat_ref: (C*HW, 256) bf16. Single MXU matmul replaces
    # pool + dwconv + GAP + pointwise conv + Linear1.
    h = jnp.dot(x_ref[...], bmat_ref[...],
                preferred_element_type=jnp.float32) + bcomb_ref[...]
    h = jnp.maximum(h, 0.0).astype(w2_ref.dtype)
    # TODO(synk): Dropout(0.5) is identity in eval mode; train-mode RNG dropout not implemented.
    out_ref[...] = jnp.dot(h, w2_ref[...],
                           preferred_element_type=jnp.float32) + b2_ref[...]


def classifier_ew_kernel(x_ref, a_ref, bdw_ref, wc_ref, bc_ref, w2_ref, b2_ref, out_ref):
    # v5e path: elementwise mul + lane reduce (HBM-bound there), amap kept resident in f32.
    x = x_ref[...].astype(jnp.float32)                          # (tile_n, C, HW)
    feat = jnp.sum(x * a_ref[...][None, :, :], axis=2) + bdw_ref[...]     # (tile_n, C)
    h = jnp.maximum(
        jnp.dot(feat, wc_ref[...], preferred_element_type=jnp.float32) + bc_ref[...], 0.0)
    # TODO(synk): Dropout(0.5) is identity in eval mode; train-mode RNG dropout not implemented.
    out_ref[...] = jnp.dot(h, w2_ref[...],
                           preferred_element_type=jnp.float32) + b2_ref[...]


# ----------------------------------------------------------------------------
# Wrapper (constant folding + pallas_call)
# ----------------------------------------------------------------------------
def classifier_forward(x, params, num_classes, tile_n=None, fold_matmul=None):
    N, C, H, W = x.shape
    HW = H * W
    CHW = C * HW
    KP = ((num_classes + LANE - 1) // LANE) * LANE           # lane-dense output slab

    if fold_matmul is None:
        fold_matmul = _default_use_fold()

    amap, wc, bc = _fold_constants(params, C, H, W)
    budget = _vmem_budget_bytes()

    if fold_matmul:
        bmat = (amap[:, :, None] * wc[:, None, :]).reshape(CHW, HIDDEN).astype(jnp.bfloat16)
        bcomb = (jnp.einsum('c,cj->j', params['b_dw'], wc,
                            precision=lax.Precision.HIGHEST) + bc
                 ).reshape(1, HIDDEN).astype(jnp.float32)
        w2_t = (jnp.zeros((HIDDEN, KP), jnp.float32)
                .at[:, :num_classes].set(params['w2'].T).astype(jnp.bfloat16))
        b2 = jnp.zeros((1, KP), jnp.float32).at[:, :num_classes].set(params['b2'])
        # True per-row footprint: double-buffered bf16 x tile + f32/bf16 h + double-buffered out.
        per_row = 2 * CHW * 2 + HIDDEN * (4 + 2) + 2 * KP * 4
        resident = 2 * (CHW * HIDDEN * 2 + HIDDEN * 4 + HIDDEN * KP * 2 + KP * 4)
    else:
        amap_f32 = amap.astype(jnp.float32)
        bdw = params['b_dw'].reshape(1, C).astype(jnp.float32)
        wc_f32 = wc.astype(jnp.float32)
        bc2 = bc.reshape(1, HIDDEN).astype(jnp.float32)
        w2_t = jnp.zeros((HIDDEN, KP), jnp.float32).at[:, :num_classes].set(params['w2'].T)
        b2 = jnp.zeros((1, KP), jnp.float32).at[:, :num_classes].set(params['b2'])
        # x bf16 (double-buffered) + f32 upcast + (x*a) product temp + small vectors + out.
        per_row = 2 * CHW * 2 + 2 * CHW * 4 + (C + HIDDEN) * 4 + 2 * KP * 4
        resident = 2 * (CHW * 4 + C * 4 + C * HIDDEN * 4 + HIDDEN * 4 + HIDDEN * KP * 4 + KP * 4)

    avail = budget - resident - (2 << 20)
    if avail < per_row * SUB:
        # TODO(synk): for very large C*H*W, split the folded weight slab along the C*HW
        # contraction dim and accumulate; here we just clamp to a minimal batch tile.
        avail = per_row * SUB

    if tile_n is None:
        n_pad = ((N + SUB - 1) // SUB) * SUB
        tile_n = _pick_batch_tile(n_pad, per_row, avail)
    n_pad = ((N + tile_n - 1) // tile_n) * tile_n
    grid = (n_pad // tile_n,)

    x3 = x.reshape(N, C, HW).astype(jnp.bfloat16)
    if n_pad != N:
        x3 = jnp.concatenate([x3, jnp.zeros((n_pad - N, C, HW), jnp.bfloat16)], axis=0)

    def const_spec(shape):
        nd = len(shape)
        return pl.BlockSpec(shape, lambda i, nd=nd: (0,) * nd)

    compiler_params = pltpu.CompilerParams(
        dimension_semantics=("parallel",),
        vmem_limit_bytes=int(budget))

    if fold_matmul:
        x_flat = x3.reshape(n_pad, CHW)                      # fully lane/sublane dense
        cost = pl.CostEstimate(
            flops=2 * n_pad * CHW * HIDDEN + 2 * n_pad * HIDDEN * KP,
            transcendentals=0,
            bytes_accessed=(n_pad * CHW * 2 + CHW * HIDDEN * 2
                            + HIDDEN * KP * 2 + n_pad * KP * 4))
        out_full = pl.pallas_call(
            classifier_fold_kernel,
            out_shape=jax.ShapeDtypeStruct((n_pad, KP), jnp.float32),
            grid=grid,
            in_specs=[
                pl.BlockSpec((tile_n, CHW), lambda i: (i, 0)),   # x tile, pipelined
                const_spec(bmat.shape),                          # resident constants below
                const_spec(bcomb.shape),
                const_spec(w2_t.shape),
                const_spec(b2.shape),
            ],
            out_specs=pl.BlockSpec((tile_n, KP), lambda i: (i, 0)),
            compiler_params=compiler_params,
            cost_estimate=cost,
        )(x_flat, bmat, bcomb, w2_t, b2)
    else:
        cost = pl.CostEstimate(
            flops=2 * n_pad * CHW + 2 * n_pad * C * HIDDEN + 2 * n_pad * HIDDEN * KP,
            transcendentals=0,
            bytes_accessed=(n_pad * CHW * 2 + CHW * 4 + C * HIDDEN * 4
                            + HIDDEN * KP * 4 + n_pad * KP * 4))
        out_full = pl.pallas_call(
            classifier_ew_kernel,
            out_shape=jax.ShapeDtypeStruct((n_pad, KP), jnp.float32),
            grid=grid,
            in_specs=[
                pl.BlockSpec((tile_n, C, HW), lambda i: (i, 0, 0)),
                const_spec(amap_f32.shape),
                const_spec(bdw.shape),
                const_spec(wc_f32.shape),
                const_spec(bc2.shape),
                const_spec(w2_t.shape),
                const_spec(b2.shape),
            ],
            out_specs=pl.BlockSpec((tile_n, KP), lambda i: (i, 0)),
            compiler_params=compiler_params,
            cost_estimate=cost,
        )(x3, amap_f32, bdw, wc_f32, bc2, w2_t, b2)

    return out_full[:N, :num_classes]


# ----------------------------------------------------------------------------
# Deterministic parameter init (shapes per the PyTorch module __init__)
# ----------------------------------------------------------------------------
def init_params(key, in_channels, num_classes):
    C, C2 = in_channels, in_channels // 2
    ks = jax.random.split(key, 8)

    def rnd(k, shape, scale):
        return scale * jax.random.normal(k, shape, jnp.float32)

    return {
        'w_dw': rnd(ks[0], (C, 1, KSIZE, KSIZE), 0.3),   # depthwise conv weight
        'b_dw': rnd(ks[1], (C,), 0.1),
        'w_pw': rnd(ks[2], (C2, C), 0.3),                # pointwise 1x1 conv weight
        'b_pw': rnd(ks[3], (C2,), 0.1),
        'w1':   rnd(ks[4], (HIDDEN, C2), 0.2),           # Linear(C//2, 256)
        'b1':   rnd(ks[5], (HIDDEN,), 0.1),
        'w2':   rnd(ks[6], (num_classes, HIDDEN), 0.1),  # Linear(256, num_classes)
        'b2':   rnd(ks[7], (num_classes,), 0.1),
    }


# ----------------------------------------------------------------------------
# Pure-JAX reference (f32, follows the module structure op-by-op)
# ----------------------------------------------------------------------------
def reference_forward(x, params):
    N, C, H, W = x.shape
    P_H = jnp.asarray(adaptive_pool_matrix(H, POOL_H))
    P_W = jnp.asarray(adaptive_pool_matrix(W, POOL_W))
    pooled = jnp.einsum('ph,nchw,qw->ncpq', P_H, x, P_W,
                        precision=lax.Precision.HIGHEST)
    dw = lax.conv_general_dilated(
        pooled, params['w_dw'], window_strides=(STRIDE, STRIDE),
        padding=((PAD, PAD), (PAD, PAD)), feature_group_count=C,
        dimension_numbers=('NCHW', 'OIHW', 'NCHW'),
        precision=lax.Precision.HIGHEST)
    dw = dw + params['b_dw'][None, :, None, None]
    pw = jnp.einsum('oc,nchw->nohw', params['w_pw'], dw,
                    precision=lax.Precision.HIGHEST)
    pw = pw + params['b_pw'][None, :, None, None]
    gap = jnp.mean(pw, axis=(2, 3))
    h = jnp.maximum(gap @ params['w1'].T + params['b1'], 0.0)
    return h @ params['w2'].T + params['b2']


if __name__ == "__main__":
    N, C, H, W, K = 16, 4, 16, 16, 10
    key = jax.random.PRNGKey(0)
    kx, kp = jax.random.split(key)
    x = jax.random.normal(kx, (N, C, H, W), jnp.float32)
    params = init_params(kp, C, K)
    ref = reference_forward(x, params)

    # Exercise both code paths (folded-matmul default path, and the v5e elementwise path);
    # auto tile picker chooses tile_n=8 -> grid=(2,) so the batch pipeline / parallel axis runs.
    for fold in (True, False):
        out = jax.block_until_ready(classifier_forward(x, params, K, fold_matmul=fold))
        assert out.shape == (N, K)
        max_err = float(jnp.max(jnp.abs(out - ref)))
        # Tolerance covers bf16 quantization of x / folded weights (f32 accumulation).
        assert jnp.allclose(out, ref, rtol=2e-2, atol=2e-2), (
            f"fold_matmul={fold}: mismatch, max abs diff = {max_err}")
    print("KERNEL_OK")
</pallas_src>

<mosaic_0001>
module attributes {stable_mosaic.version = 11 : i64} {
  func.func @classifier_fold_kernel(%arg0: i32, %arg1: memref<8x1024xbf16, #tpu.memory_space<vmem>>, %arg2: memref<1024x256xbf16, #tpu.memory_space<vmem>>, %arg3: memref<1x256xf32, #tpu.memory_space<vmem>>, %arg4: memref<256x128xbf16, #tpu.memory_space<vmem>>, %arg5: memref<1x128xf32, #tpu.memory_space<vmem>>, %arg6: memref<8x128xf32, #tpu.memory_space<vmem>>) attributes {dimension_semantics = [#tpu.dimension_semantics<parallel>], iteration_bounds = array<i64: 2>, scalar_prefetch = 0 : i64, scratch_operands = 0 : i64, tpu.core_type = #tpu.core_type<tc>, window_params = [{transform_indices = @transform_0, window_bounds = array<i64: 8, 1024>}, {pipeline_mode = #tpu.pipeline_mode<synchronous>, transform_indices = @transform_1, window_bounds = array<i64: 1024, 256>}, {pipeline_mode = #tpu.pipeline_mode<synchronous>, transform_indices = @transform_2, window_bounds = array<i64: 1, 256>}, {pipeline_mode = #tpu.pipeline_mode<synchronous>, transform_indices = @transform_3, window_bounds = array<i64: 256, 128>}, {pipeline_mode = #tpu.pipeline_mode<synchronous>, transform_indices = @transform_4, window_bounds = array<i64: 1, 128>}, {transform_indices = @transform_5, window_bounds = array<i64: 8, 128>}]} {
    %c0 = arith.constant 0 : index
    %c0_0 = arith.constant 0 : index
    %0 = vector.load %arg1[%c0, %c0_0] : memref<8x1024xbf16, #tpu.memory_space<vmem>>, vector<8x1024xbf16>
    %c0_1 = arith.constant 0 : index
    %c0_2 = arith.constant 0 : index
    %1 = vector.load %arg2[%c0_1, %c0_2] : memref<1024x256xbf16, #tpu.memory_space<vmem>>, vector<1024x256xbf16>
    %cst = arith.constant dense<0.000000e+00> : vector<8x256xf32>
    %2 = tpu.matmul %0, %1, %cst {dimension_numbers = #tpu.dot_dimension_numbers<[1], [0], [0], [1], [0, 0, 1, 1], [], []>} : vector<8x1024xbf16>, vector<1024x256xbf16>, vector<8x256xf32> -> vector<8x256xf32>
    %c0_3 = arith.constant 0 : index
    %c0_4 = arith.constant 0 : index
    %3 = vector.load %arg3[%c0_3, %c0_4] : memref<1x256xf32, #tpu.memory_space<vmem>>, vector<1x256xf32>
    %4 = vector.broadcast %3 : vector<1x256xf32> to vector<8x256xf32>
    %5 = arith.addf %2, %4 : vector<8x256xf32>
    %cst_5 = arith.constant 0.000000e+00 : f32
    %6 = vector.broadcast %cst_5 : f32 to vector<8x256xf32>
    %7 = arith.maximumf %5, %6 : vector<8x256xf32>
    %8 = arith.truncf %7 : vector<8x256xf32> to vector<8x256xbf16>
    %c0_6 = arith.constant 0 : index
    %c0_7 = arith.constant 0 : index
    %9 = vector.load %arg4[%c0_6, %c0_7] : memref<256x128xbf16, #tpu.memory_space<vmem>>, vector<256x128xbf16>
    %cst_8 = arith.constant dense<0.000000e+00> : vector<8x128xf32>
    %10 = tpu.matmul %8, %9, %cst_8 {dimension_numbers = #tpu.dot_dimension_numbers<[1], [0], [0], [1], [0, 0, 1, 1], [], []>} : vector<8x256xbf16>, vector<256x128xbf16>, vector<8x128xf32> -> vector<8x128xf32>
    %c0_9 = arith.constant 0 : index
    %c0_10 = arith.constant 0 : index
    %11 = vector.load %arg5[%c0_9, %c0_10] : memref<1x128xf32, #tpu.memory_space<vmem>>, vector<1x128xf32>
    %12 = vector.broadcast %11 : vector<1x128xf32> to vector<8x128xf32>
    %13 = arith.addf %10, %12 : vector<8x128xf32>
    %c0_11 = arith.constant 0 : index
    %c0_12 = arith.constant 0 : index
    %14 = vector.load %arg6[%c0_11, %c0_12] : memref<8x128xf32, #tpu.memory_space<vmem>>, vector<8x128xf32>
    tpu.vector_store %arg6[%c0_11, %c0_12], %13 {strides = array<i32>} : memref<8x128xf32, #tpu.memory_space<vmem>>, vector<8x128xf32>,
    return
  }
  func.func @transform_0(%arg0: i32) -> (i32, i32) {
    %c0_i32 = arith.constant 0 : i32
    %c0_i32_0 = arith.constant 0 : i32
    return %arg0, %c0_i32 : i32, i32
  }
  func.func @transform_1(%arg0: i32) -> (i32, i32) {
    %c0_i32 = arith.constant 0 : i32
    %c0_i32_0 = arith.constant 0 : i32
    %c0_i32_1 = arith.constant 0 : i32
    return %c0_i32, %c0_i32_0 : i32, i32
  }
  func.func @transform_2(%arg0: i32) -> (i32, i32) {
    %c0_i32 = arith.constant 0 : i32
    %c0_i32_0 = arith.constant 0 : i32
    %c0_i32_1 = arith.constant 0 : i32
    return %c0_i32, %c0_i32_0 : i32, i32
  }
  func.func @transform_3(%arg0: i32) -> (i32, i32) {
    %c0_i32 = arith.constant 0 : i32
    %c0_i32_0 = arith.constant 0 : i32
    %c0_i32_1 = arith.constant 0 : i32
    return %c0_i32, %c0_i32_0 : i32, i32
  }
  func.func @transform_4(%arg0: i32) -> (i32, i32) {
    %c0_i32 = arith.constant 0 : i32
    %c0_i32_0 = arith.constant 0 : i32
    %c0_i32_1 = arith.constant 0 : i32
    return %c0_i32, %c0_i32_0 : i32, i32
  }
  func.func @transform_5(%arg0: i32) -> (i32, i32) {
    %c0_i32 = arith.constant 0 : i32
    %c0_i32_0 = arith.constant 0 : i32
    return %arg0, %c0_i32 : i32, i32
  }
}

</mosaic_0001>

<bundles_post_ra>
// kernel: tpu_custom_call.1
= control target key start
LH: loop header
LB: loop body
LE: loop exit
PB: predicated region body
PF: predicated region fallthrough
CT: control target
= control target key end

     0   :  { %10 = vsyncpa [#allocation3], 0  ;;  %s2394_s0 = inlined_call_operand.hbm [shape: bf16[16,1024], index: 0, kind: input, shape index: {}]   ;;  %s2395_s1 = inlined_call_operand.hbm [shape: bf16[1024,256], index: 1, kind: input, shape index: {}]   ;;  %s2396_s2 = inlined_call_operand.vmem [shape: f32[1,256], index: 2, kind: input, shape index: {}]   ;;  %s2397_s3 = inlined_call_operand.hbm [shape: bf16[256,128], index: 3, kind: input, shape index: {}]   ;;  %s2398_s4 = inlined_call_operand.vmem [shape: f32[1,128], index: 4, kind: input, shape index: {}]   ;;  %s2399_s5 = inlined_call_operand.hbm [shape: f32[16,128], index: 5, kind: output, shape index: {}]  }
   0x1   :  { %12 = vsyncpa [#allocation3 + $0x1], 0 }
   0x2   :  { %13 = vsyncpa [#allocation6], 0 }
   0x3   :  { %14 = vsyncpa [#allocation4], 0 }
   0x4   :  { %16 = vsyncpa [#allocation4 + $0x1], 0  ;;  %s2198_s18 = smov 0   ;;  %s2200_s19 = smov 0  }
   0x5   :  { %s2202_s20 = smov 0   ;;  %s2204_s21 = smov 0  }
   0x6 LB: > { %s2219_s22 = sadd.s32 4294967295, %s2158_s21   ;;  %s1530_s23 = sadd.s32 4294967294, %s2158_s21   ;;  %s2158_s21 = sphi %s2204_s21, %s2421_s21   ;;  %s2154_s20 = sphi %s2202_s20, %s2420_s20   ;;  %s2150_s19 = sphi %s2200_s19, %s2419_s19   ;;  %s2146_s18 = sphi %s2198_s18, %s2418_s18  }
   0x7   : > { %p42_p0 = scmp.ne.s32.totalorder %s2150_s19, %s2146_s18  ;;  %p2400_p1 = scmp.eq.s32.totalorder %s2219_s22, 0 }
   0x8   : > { %p156_p3 = scmp.eq.s32.totalorder %s1530_s23, 1  ;;  %p1531_p5 = scmp.ge.s32.totalorder %s2158_s21, 1 }
   0x9   : > { %p2228_p4 = por %p2400_p1, %p42_p0  ;;  %p163_p7 = scmp.lt.s32.totalorder %s2158_s21, 3 }
   0xa   : > { %p2233_p6 = por %p156_p3, %p42_p0  ;;  %s2160_s27 = smov [#allocation5]  }
   0xb   : > { %s2404_s24 = scalar_select %p2228_p4, 1, 0 }
   0xc   : > { %s2405_s25 = scalar_select %p2233_p6, 1, 0 }
   0xd   : > { %p2238_p8 = pnand %p1531_p5, %p163_p7  ;;  %s175_s28 = sshll.u32 %s2160_s27, 4  ;;  %s176_s28 = int_to_ptr.vmem [resolvable:$true] %s175_s28 }
   0xe   : > { %s2161_s30 = smov [#allocation7]   ;;  %s2021_s7 = scalar_lea.vmem %s176_s28, 16384 }
   0xf   : > { %s2406_s26 = scalar_select %p2238_p8, 1, 0 }
  0x10   : > { %p1735_p9 = pneg %p2238_p8  ;;  %s191_s6 = sshll.u32 %s2161_s30, 4  ;;  %s192_s6 = int_to_ptr.vmem [resolvable:$true] %s191_s6 }
  0x11   : > { %p2022_p13 = scmp.ne.s32.totalorder %s176_s28, %s2021_s7  ;;  %p2029_p5 = scmp.lt.s32.totalorder %s176_s28, %s176_s28 }
  0x12   : > { %p2247_p11 = pnand %p1735_p9, %p2400_p1  ;;  %p2030_p7 = scmp.lt.s32.totalorder %s2021_s7, %s2021_s7 }
  0x14   : > { %p2012_p12 = pneg %p2247_p11  ;;  %p2031_p10 = por %p2030_p7, %p2029_p5 }
  0x16   : > { %p2024_p0 = pnand %p2022_p13, %p2012_p12 }
  0x18   : > { %p2025_p3 = pneg %p2024_p0 }
  0x1a   : > { %p2032_p9 = pnand %p2031_p10, %p2025_p3 }
  0x1c   : > { %2035 = shalt.err (!%p2032_p9)
}
  0x1d   : > { %s2162_s8 = smov 128   ;;  %s2163_s9 = smov 8  }
  0x1e   : > { %1738 = dma.hbm_to_vmem [thread:$0]  (!%p2247_p11), %s2395_s1, 16384, %s176_s28, [#allocation6], %s2162_s8, %s2162_s8, %s2163_s9  }
  0x1f   : > { %s2047_s12 = scalar_lea.vmem %s192_s6, 2048  ;;  %p2055_p2 = scmp.lt.s32.totalorder %s192_s6, %s192_s6 }
  0x20   : > { %p2048_p1 = scmp.ne.s32.totalorder %s192_s6, %s2047_s12  ;;  %p2056_p6 = scmp.lt.s32.totalorder %s2047_s12, %s2047_s12 }
  0x22   : > { %p2050_p13 = pnand %p2048_p1, %p2012_p12  ;;  %p2057_p5 = por %p2056_p6, %p2055_p2 }
  0x24   : > { %p2051_p0 = pneg %p2050_p13 }
  0x26   : > { %p2058_p10 = pnand %p2057_p5, %p2051_p0 }
  0x28   : > { %2061 = shalt.err (!%p2058_p10)
}
  0x29   : > { %s2164_s13 = smov 64   ;;  %s2165_s14 = smov 4  }
  0x2a   : > { %1741 = dma.hbm_to_vmem [thread:$0]  (!%p2247_p11), %s2397_s3, 2048, %s192_s6, [#allocation6], %s2164_s13, %s2164_s13, %s2165_s14  }
  0x2b   : > { %s2270_s17 = sadd.s32 1, %s2158_s21   ;;  %s29_s27 = sadd.s32 1, %s2154_s20 }
  0x2c   : > { %s26_s23 = ssub.s32 %s2158_s21, %s2270_s17  ;;  %p36_p2 = scmp.ne.s32.totalorder %s2154_s20, %s2150_s19 }
  0x2d   : > { %p27_p1 = scmp.eq.s32.totalorder %s26_s23, 0  ;;  %p37_p6 = scmp.eq.s32.totalorder %s2158_s21, 0 }
  0x2e   : > { %p2408_p3 = scmp.eq.s32.totalorder %s2219_s22, 1  ;;  %p1752_p9 = scmp.lt.s32.totalorder %s2158_s21, 2 }
  0x2f   : > { %s2279_s28 = scalar_select %p27_p1, %s2154_s20, %s29_s27  }
  0x30   : > { %p38_p12 = por %p37_p6, %p36_p2  ;;  %p2283_p7 = por %p2408_p3, %p36_p2 }
  0x31   : > { %s208_s29 = sand.u32 1, %s2154_s20   ;;  %s1700_s6 = sshll.u32 %s2158_s21, 9 }
  0x32   : > { %s2409_s30 = scalar_select %p2283_p7, 1, 0 }
  0x33   : > { %s1535_s7 = sshll.u32 %s208_s29, 5  ;;  %s2293_s10 = scalar_lea.hbm %s2394_s0, %s1700_s6 }
  0x34   : > { %s212_s11 = scalar_lea.vmem [#allocation2], %s1535_s7  ;;  %p2295_p11 = pnand %p1752_p9, %p38_p12 }
  0x35   : > { %s220_s12 = sshll.u32 %s212_s11, 4  ;;  %s209_s14 = scalar_lea.sflag [#allocation3], %s208_s29  ;;  %s221_s12 = int_to_ptr.vmem [resolvable:$true] %s220_s12 }
  0x36   : > { %s2062_s15 = scalar_lea.hbm %s2293_s10, 512  ;;  %p2064_p0 = pneg %p2295_p11 }
  0x37   : > { %p2063_p13 = scmp.ne.s32.totalorder %s2293_s10, %s2062_s15  ;;  %s2067_s27 = scalar_lea.hbm %s2394_s0, 1024 }
  0x38   : > { %p2068_p1 = scmp.lt.s32.totalorder %s2293_s10, %s2394_s0  ;;  %p2069_p2 = scmp.lt.s32.totalorder %s2067_s27, %s2062_s15 }
  0x39   : > { %p2065_p5 = pnand %p2064_p0, %p2063_p13 }
  0x3a   : > { %p2070_p6 = por %p2069_p2, %p2068_p1 }
  0x3b   : > { %p2066_p10 = pneg %p2065_p5 }
  0x3d   : > { %p2071_p12 = pnand %p2070_p6, %p2066_p10 }
  0x3f   : > { %2074 = shalt.err (!%p2071_p12)
}
  0x40   : > { %s2075_s8 = scalar_lea.vmem %s221_s12, 512  ;;  %s2166_s29 = smov [#allocation2]  }
  0x41   : > { %p2076_p3 = scmp.ne.s32.totalorder %s221_s12, %s2075_s8  ;;  %s2080_s9 = sshll.u32 %s2166_s29, 4  ;;  %s2081_s9 = int_to_ptr.vmem [resolvable:$false] %s2080_s9 }
  0x42   : > { %s2082_s11 = scalar_lea.vmem %s2081_s9, 1024  ;;  %p2083_p13 = scmp.lt.s32.totalorder %s221_s12, %s2081_s9 }
  0x43   : > { %p2078_p9 = pnand %p2076_p3, %p2064_p0  ;;  %p2084_p5 = scmp.lt.s32.totalorder %s2082_s11, %s2075_s8 }
  0x45   : > { %p2079_p7 = pneg %p2078_p9  ;;  %p2085_p4 = por %p2084_p5, %p2083_p13 }
  0x47   : > { %p2086_p8 = pnand %p2085_p4, %p2079_p7 }
  0x49   : > { %2089 = shalt.err (!%p2086_p8)
}
  0x4a   : > { %1745 = dma.hbm_to_vmem [thread:$0]  (!%p2295_p11), %s2293_s10, 512, %s221_s12, %s209_s14  }
  0x4b   : > { %p2411_p10 = scmp.ne.s32.totalorder %s2406_s26, 0 }
  0x4c   : > { %s2316_s15 = sand.u32 (!%p2411_p10), 1, %s2150_s19   ;;  %p2412_p0 = scmp.ne.s32.totalorder (!%p2411_p10), %s2404_s24, 0 }
  0x4d   : > { %229 = sbr.rel (%p2411_p10) target bundleno = 631 (0x277), region = 40  ;;  %s1539_s16 = sshll.u32 (!%p2411_p10), %s2316_s15, 5 }
  0x4e   : > { %s232_s23 = scalar_lea.sflag (!%p2411_p10), [#allocation3], %s2316_s15  ;;  %s2320_s27 = scalar_lea.vmem (!%p2411_p10), [#allocation2], %s1539_s16 }
  0x52   : > { %2133 = dma.done.wait (%p2412_p0), %s232_s23, 512  }
  0x53   : > { %2135 = vsyncadd (%p2412_p0), %s232_s23, 4294966784  ;;  %p2413_p4 = scmp.eq.s32.totalorder %s2219_s22, 0 }
  0x55   : > { %2137 = dma.done.wait (%p2413_p4), [#allocation6], 18432   ;;  %p2414_p8 = pmov %p2413_p4 }
  0x56   : > { %v1794_v0 = vld [vmem:[#allocation5 + $0x74] ss:$8 sps:$4 sm:$0xff]   ;;  %v1798_v2 = vld [vmem:[#allocation5 + $0x70] ss:$8 sps:$4 sm:$0xff]   ;;  %v1800_v4 = vld [vmem:[#allocation5 + $0x64] ss:$8 sps:$4 sm:$0xff]  }
  0x57   : > { %2139 = vsyncadd (%p2414_p8), [#allocation6], 4294948864  ;;  %v1796_v1 = vld [vmem:[#allocation5 + $0x174] ss:$8 sps:$4 sm:$0xff]   ;;  %1083 = vmatprep.subr.bf16.mxu0 %v1794_v0  ;;  %v1799_v3 = vld [vmem:[#allocation5 + $0x170] ss:$8 sps:$4 sm:$0xff]  }
  0x58   : > { %1124 = vmatprep.subr.bf16.mxu1 %v1796_v1  ;;  %1084 = vmatpush1.bf16.msra.mxu0 %v1798_v2  ;;  %v1802_v5 = vld [vmem:[#allocation5 + $0x164] ss:$8 sps:$4 sm:$0xff]   ;;  %v1804_v6 = vld [vmem:[#allocation5 + $0x60] ss:$8 sps:$4 sm:$0xff]   ;;  %v1806_v8 = vld [vmem:[#allocation5 + $0x54] ss:$8 sps:$4 sm:$0xff]  }
  0x59   : > { %1125 = vmatpush1.bf16.msra.mxu1 %v1799_v3  ;;  %1085 = vmatprep.subr.bf16.mxu0 %v1800_v4  ;;  %v1805_v7 = vld [vmem:[#allocation5 + $0x160] ss:$8 sps:$4 sm:$0xff]   ;;  %v1808_v9 = vld [vmem:[#allocation5 + $0x154] ss:$8 sps:$4 sm:$0xff]   ;;  %v1810_v10 = vld [vmem:[#allocation5 + $0x50] ss:$8 sps:$4 sm:$0xff]  }
  0x5a   : > { %1126 = vmatprep.subr.bf16.mxu1 %v1802_v5  ;;  %v1811_v11 = vld [vmem:[#allocation5 + $0x150] ss:$8 sps:$4 sm:$0xff]   ;;  %v1812_v12 = vld [vmem:[#allocation5 + $0x44] ss:$8 sps:$4 sm:$0xff]   ;;  %v1816_v14 = vld [vmem:[#allocation5 + $0x40] ss:$8 sps:$4 sm:$0xff]  }
  0x5b   : > { %v1814_v13 = vld [vmem:[#allocation5 + $0x144] ss:$8 sps:$4 sm:$0xff]   ;;  %v1817_v15 = vld [vmem:[#allocation5 + $0x140] ss:$8 sps:$4 sm:$0xff]   ;;  %v1818_v16 = vld [vmem:[#allocation5 + $0x34] ss:$8 sps:$4 sm:$0xff]  }
  0x5c   : > { %1086 = vmatpush1.bf16.msra.mxu0 %v1804_v6  ;;  %v1820_v17 = vld [vmem:[#allocation5 + $0x134] ss:$8 sps:$4 sm:$0xff]   ;;  %v1822_v18 = vld [vmem:[#allocation5 + $0x30] ss:$8 sps:$4 sm:$0xff]   ;;  %v1824_v20 = vld [vmem:[#allocation5 + $0x24] ss:$8 sps:$4 sm:$0xff]  }
  0x5d   : > { %1127 = vmatpush1.bf16.msra.mxu1 %v1805_v7  ;;  %1087 = vmatprep.subr.bf16.mxu0 %v1806_v8  ;;  %v1823_v19 = vld [vmem:[#allocation5 + $0x130] ss:$8 sps:$4 sm:$0xff]   ;;  %v1826_v21 = vld [vmem:[#allocation5 + $0x124] ss:$8 sps:$4 sm:$0xff]   ;;  %v1828_v22 = vld [vmem:[#allocation5 + $0x20] ss:$8 sps:$4 sm:$0xff]  }
  0x5e   : > { %1128 = vmatprep.subr.bf16.mxu1 %v1808_v9  ;;  %v1829_v23 = vld [vmem:[#allocation5 + $0x120] ss:$8 sps:$4 sm:$0xff]   ;;  %v1830_v24 = vld [vmem:[#allocation5 + $0x14] ss:$8 sps:$4 sm:$0xff]   ;;  %v1834_v26 = vld [vmem:[#allocation5 + $0x10] ss:$8 sps:$4 sm:$0xff]  }
  0x5f   : > { %v1832_v25 = vld [vmem:[#allocation5 + $0x114] ss:$8 sps:$4 sm:$0xff]   ;;  %v1835_v27 = vld [vmem:[#allocation5 + $0x110] ss:$8 sps:$4 sm:$0xff]   ;;  %v1836_v28 = vld [vmem:[#allocation5 + $0x4] ss:$8 sps:$4 sm:$0xff]  }
  0x60   : > { %1088 = vmatpush1.bf16.msra.mxu0 %v1810_v10  ;;  %v1838_v29 = vld [vmem:[#allocation5 + $0x104] ss:$8 sps:$4 sm:$0xff]   ;;  %v1840_v30 = vld [vmem:[#allocation5] ss:$8 sps:$4 sm:$0xff]   ;;  %v1842_v32 = vld [vmem:[#allocation5 + $0xf4] ss:$8 sps:$4 sm:$0xff]  }
  0x61   : > { %1129 = vmatpush1.bf16.msra.mxu1 %v1811_v11  ;;  %1089 = vmatprep.subr.bf16.mxu0 %v1812_v12  ;;  %v1841_v31 = vld [vmem:[#allocation5 + $0x100] ss:$8 sps:$4 sm:$0xff]   ;;  %v1844_v33 = vld [vmem:[#allocation5 + $0x1f4] ss:$8 sps:$4 sm:$0xff]   ;;  %v1846_v34 = vld [vmem:[#allocation5 + $0xf0] ss:$8 sps:$4 sm:$0xff]  }
  0x62   : > { %1130 = vmatprep.subr.bf16.mxu1 %v1814_v13  ;;  %v1847_v35 = vld [vmem:[#allocation5 + $0x1f0] ss:$8 sps:$4 sm:$0xff]   ;;  %v1848_v36 = vld [vmem:[#allocation5 + $0xe4] ss:$8 sps:$4 sm:$0xff]   ;;  %v1852_v38 = vld [vmem:[#allocation5 + $0xe0] ss:$8 sps:$4 sm:$0xff]  }
  0x63   : > { %v1850_v37 = vld [vmem:[#allocation5 + $0x1e4] ss:$8 sps:$4 sm:$0xff]   ;;  %v1853_v39 = vld [vmem:[#allocation5 + $0x1e0] ss:$8 sps:$4 sm:$0xff]   ;;  %v1854_v40 = vld [vmem:[#allocation5 + $0xd4] ss:$8 sps:$4 sm:$0xff]  }
  0x64   : > { %1090 = vmatpush1.bf16.msra.mxu0 %v1816_v14  ;;  %v1856_v41 = vld [vmem:[#allocation5 + $0x1d4] ss:$8 sps:$4 sm:$0xff]   ;;  %v1858_v42 = vld [vmem:[#allocation5 + $0xd0] ss:$8 sps:$4 sm:$0xff]   ;;  %v1860_v44 = vld [vmem:[#allocation5 + $0xc4] ss:$8 sps:$4 sm:$0xff]  }
  0x65   : > { %1131 = vmatpush1.bf16.msra.mxu1 %v1817_v15  ;;  %1091 = vmatprep.subr.bf16.mxu0 %v1818_v16  ;;  %v1859_v43 = vld [vmem:[#allocation5 + $0x1d0] ss:$8 sps:$4 sm:$0xff]   ;;  %v1862_v45 = vld [vmem:[#allocation5 + $0x1c4] ss:$8 sps:$4 sm:$0xff]   ;;  %v1864_v49 = vld [vmem:[#allocation5 + $0xc0] ss:$8 sps:$4 sm:$0xff]  }
  0x66   : > { %1132 = vmatprep.subr.bf16.mxu1 %v1820_v17  ;;  %v271_v46 = vld [vmem:[%s2320_s27] sm:$0xff]  ;;  %v272_v48 = vld [vmem:[%s2320_s27 + $0x8] sm:$0xff]  ;;  %v1866_v52 = vld [vmem:[#allocation5 + $0xb4] ss:$8 sps:$4 sm:$0xff]   ;;  %s1542_s10 = sshll.u32 %s2316_s15, 3  ;;  %s1697_s14 = sshll.u32 %s2219_s22, 7 }
  0x67   : > { %v1544_v47 = vcombine.high %v271_v46, %v271_v46  ;;  %v1865_v50 = vld [vmem:[#allocation5 + $0x1c0] ss:$8 sps:$4 sm:$0xff]   ;;  %v1546_v51 = vcombine.high %v272_v48, %v272_v48  ;;  %v1868_v53 = vld [vmem:[#allocation5 + $0x1b4] ss:$8 sps:$4 sm:$0xff]   ;;  %v1870_v54 = vld [vmem:[#allocation5 + $0xb0] ss:$8 sps:$4 sm:$0xff]   ;;  %v1543_v6 = vcombine.low %v271_v46, %v271_v46  ;;  %v1545_v7 = vcombine.low %v272_v48, %v272_v48  ;;  %s2357_s9 = scalar_lea.hbm %s2399_s5, %s1697_s14 }
  0x68   : > { %1092 = vmatpush1.bf16.msra.mxu0 %v1822_v18  ;;  %v1871_v55 = vld [vmem:[#allocation5 + $0x1b0] ss:$8 sps:$4 sm:$0xff]   ;;  %v1872_v56 = vld [vmem:[#allocation5 + $0xa4] ss:$8 sps:$4 sm:$0xff]   ;;  %v1876_v58 = vld [vmem:[#allocation5 + $0xa0] ss:$8 sps:$4 sm:$0xff]  }
  0x69   : > { %1133 = vmatpush1.bf16.msra.mxu1 %v1823_v19  ;;  %1093 = vmatprep.subr.bf16.mxu0 %v1824_v20  ;;  %v1874_v57 = vld [vmem:[#allocation5 + $0x1a4] ss:$8 sps:$4 sm:$0xff]   ;;  %v1877_v59 = vld [vmem:[#allocation5 + $0x1a0] ss:$8 sps:$4 sm:$0xff]   ;;  %v1878_v60 = vld [vmem:[#allocation5 + $0x94] ss:$8 sps:$4 sm:$0xff]  }
  0x6a   : > { %1134 = vmatprep.subr.bf16.mxu1 %v1826_v21  ;;  %1115 = vmatprep.mubr.bf16.mxu0 %v1544_v47  ;;  %v1880_v61 = vld [vmem:[#allocation5 + $0x194] ss:$8 sps:$4 sm:$0xff]   ;;  %v1882_v62 = vld [vmem:[#allocation5 + $0x90] ss:$8 sps:$4 sm:$0xff]   ;;  %v1884_v0 = vld [vmem:[#allocation5 + $0x84] ss:$8 sps:$4 sm:$0xff]  }
  0x6b   : > { %1156 = vmatprep.mubr.bf16.mxu1 %v1546_v51  ;;  %v1883_v63 = vld [vmem:[#allocation5 + $0x190] ss:$8 sps:$4 sm:$0xff]   ;;  %v1886_v1 = vld [vmem:[#allocation5 + $0x184] ss:$8 sps:$4 sm:$0xff]   ;;  %v1888_v2 = vld [vmem:[#allocation5 + $0x80] ss:$8 sps:$4 sm:$0xff]  }
  0x6c   : > { %1094 = vmatpush1.bf16.msra.mxu0 %v1828_v22  ;;  %v1889_v3 = vld [vmem:[#allocation5 + $0x180] ss:$8 sps:$4 sm:$0xff]   ;;  %v1896_v4 = vld [vmem:[#allocation5 + $0x274] ss:$8 sps:$4 sm:$0xff]   ;;  %v1894_v8 = vld [vmem:[#allocation5 + $0x270] ss:$8 sps:$4 sm:$0xff]  }
  0x6d   : > { %1135 = vmatpush1.bf16.msra.mxu1 %v1829_v23  ;;  %1095 = vmatprep.subr.bf16.mxu0 %v1830_v24  ;;  %v1899_v5 = vld [vmem:[#allocation5 + $0x374] ss:$8 sps:$4 sm:$0xff]   ;;  %v1897_v9 = vld [vmem:[#allocation5 + $0x370] ss:$8 sps:$4 sm:$0xff]   ;;  %v1902_v10 = vld [vmem:[#allocation5 + $0x264] ss:$8 sps:$4 sm:$0xff]  }
  0x6e   : > { %1136 = vmatprep.subr.bf16.mxu1 %v1832_v25  ;;  %v1905_v11 = vld [vmem:[#allocation5 + $0x364] ss:$8 sps:$4 sm:$0xff]   ;;  %v1900_v12 = vld [vmem:[#allocation5 + $0x260] ss:$8 sps:$4 sm:$0xff]   ;;  %v1908_v14 = vld [vmem:[#allocation5 + $0x254] ss:$8 sps:$4 sm:$0xff]  }
  0x6f   : > { %v1903_v13 = vld [vmem:[#allocation5 + $0x360] ss:$8 sps:$4 sm:$0xff]   ;;  %v1911_v15 = vld [vmem:[#allocation5 + $0x354] ss:$8 sps:$4 sm:$0xff]   ;;  %v1906_v16 = vld [vmem:[#allocation5 + $0x250] ss:$8 sps:$4 sm:$0xff]  }
  0x70   : > { %1096 = vmatpush1.bf16.msra.mxu0 %v1834_v26  ;;  %v1909_v17 = vld [vmem:[#allocation5 + $0x350] ss:$8 sps:$4 sm:$0xff]   ;;  %v1914_v18 = vld [vmem:[#allocation5 + $0x244] ss:$8 sps:$4 sm:$0xff]   ;;  %v1912_v20 = vld [vmem:[#allocation5 + $0x240] ss:$8 sps:$4 sm:$0xff]  }
  0x71   : > { %1137 = vmatpush1.bf16.msra.mxu1 %v1835_v27  ;;  %1097 = vmatprep.subr.bf16.mxu0 %v1836_v28  ;;  %v1917_v19 = vld [vmem:[#allocation5 + $0x344] ss:$8 sps:$4 sm:$0xff]   ;;  %v1915_v21 = vld [vmem:[#allocation5 + $0x340] ss:$8 sps:$4 sm:$0xff]   ;;  %v1920_v22 = vld [vmem:[#allocation5 + $0x234] ss:$8 sps:$4 sm:$0xff]  }
  0x72   : > { %1138 = vmatprep.subr.bf16.mxu1 %v1838_v29  ;;  %v1923_v23 = vld [vmem:[#allocation5 + $0x334] ss:$8 sps:$4 sm:$0xff]   ;;  %v1918_v24 = vld [vmem:[#allocation5 + $0x230] ss:$8 sps:$4 sm:$0xff]   ;;  %v1926_v26 = vld [vmem:[#allocation5 + $0x224] ss:$8 sps:$4 sm:$0xff]  }
  0x73   : > { %v1921_v25 = vld [vmem:[#allocation5 + $0x330] ss:$8 sps:$4 sm:$0xff]   ;;  %v1929_v27 = vld [vmem:[#allocation5 + $0x324] ss:$8 sps:$4 sm:$0xff]   ;;  %v1924_v28 = vld [vmem:[#allocation5 + $0x220] ss:$8 sps:$4 sm:$0xff]  }
  0x74   : > { %1098 = vmatpush1.bf16.msra.mxu0 %v1840_v30  ;;  %v1927_v29 = vld [vmem:[#allocation5 + $0x320] ss:$8 sps:$4 sm:$0xff]   ;;  %v1932_v30 = vld [vmem:[#allocation5 + $0x214] ss:$8 sps:$4 sm:$0xff]   ;;  %v1950_v46 = vld [vmem:[#allocation5 + $0x2e4] ss:$8 sps:$4 sm:$0xff]  }
  0x75   : > { %1139 = vmatpush1.bf16.msra.mxu1 %v1841_v31  ;;  %1099 = vmatprep.subr.bf16.mxu0 %v1842_v32  ;;  %v1935_v31 = vld [vmem:[#allocation5 + $0x314] ss:$8 sps:$4 sm:$0xff]   ;;  %v1930_v32 = vld [vmem:[#allocation5 + $0x210] ss:$8 sps:$4 sm:$0xff]   ;;  %v1953_v47 = vld [vmem:[#allocation5 + $0x3e4] ss:$8 sps:$4 sm:$0xff]  }
  0x76   : > { %1140 = vmatprep.subr.bf16.mxu1 %v1844_v33  ;;  %v1933_v33 = vld [vmem:[#allocation5 + $0x310] ss:$8 sps:$4 sm:$0xff]   ;;  %v1948_v48 = vld [vmem:[#allocation5 + $0x2e0] ss:$8 sps:$4 sm:$0xff]   ;;  %v1959_v51 = vld [vmem:[#allocation5 + $0x3d4] ss:$8 sps:$4 sm:$0xff]  }
  0x77   : > { %s269_s6 = scalar_lea.vmem [#allocation8], %s1542_s10  ;;  %s1428_s11 = scalar_lea.sflag [#allocation4], %s2316_s15 }
  0x78   : > { %1100 = vmatpush2.bf16.msra.mxu0 %v1846_v34  ;;  %v2333_v34 = vld [vmem:[%s2320_s27 + $0x10] sm:$0xff]  ;;  %s1441_s7 = sshll.u32 %s269_s6, 4  ;;  %p2415_p11 = scmp.ne.s32.totalorder %s2409_s30, 0  ;;  %s1442_s7 = int_to_ptr.vmem [resolvable:$true] %s1441_s7 }
  0x79   : > { %1141 = vmatpush2.bf16.msra.mxu1 %v1847_v35  ;;  %1101 = vmatprep.subr.bf16.mxu0 %v1848_v36  ;;  %v2336_v35 = vld [vmem:[%s2320_s27 + $0x18] sm:$0xff]  ;;  %v1938_v36 = vld [vmem:[#allocation5 + $0x204] ss:$8 sps:$4 sm:$0xff]   ;;  %s2090_s16 = scalar_lea.vmem %s1442_s7, 128  ;;  %s2167_s22 = smov [#allocation8]  }
  0x7a   : > { %1142 = vmatprep.subr.bf16.mxu1 %v1850_v37  ;;  %v1941_v37 = vld [vmem:[#allocation5 + $0x304] ss:$8 sps:$4 sm:$0xff]   ;;  %p2091_p7 = scmp.ne.s32.totalorder %s1442_s7, %s2090_s16  ;;  %s2094_s23 = sshll.u32 %s2167_s22, 4  ;;  %s2095_s23 = int_to_ptr.vmem [resolvable:$false] %s2094_s23 }
  0x7b   : > { %s2096_s27 = scalar_lea.vmem %s2095_s23, 256  ;;  %p2097_p6 = scmp.lt.s32.totalorder %s1442_s7, %s2095_s23 }
  0x7c   : > { %1102 = vmatpush2.bf16.msra.mxu0 %v1852_v38  ;;  %v1548_v38 = vcombine.high %v2333_v34, %v2333_v34  ;;  %p2092_p1 = pnand %p2091_p7, %p2415_p11  ;;  %p2098_p12 = scmp.lt.s32.totalorder %s2096_s27, %s2090_s16 }
  0x7d   : > { %1143 = vmatpush2.bf16.msra.mxu1 %v1853_v39  ;;  %1103 = vmatprep.subr.bf16.mxu0 %v1854_v40  ;;  %v1550_v39 = vcombine.high %v2336_v35, %v2336_v35  ;;  %v1936_v40 = vld [vmem:[#allocation5 + $0x200] ss:$8 sps:$4 sm:$0xff]  }
  0x7e   : > { %1144 = vmatprep.subr.bf16.mxu1 %v1856_v41  ;;  %v1939_v41 = vld [vmem:[#allocation5 + $0x300] ss:$8 sps:$4 sm:$0xff]   ;;  %p2093_p2 = pneg %p2092_p1  ;;  %p2099_p3 = por %p2098_p12, %p2097_p6 }
  0x80   : > { %1104 = vmatpush2.bf16.msra.mxu0 %v1858_v42  ;;  %v1944_v42 = vld [vmem:[#allocation5 + $0x2f4] ss:$8 sps:$4 sm:$0xff]   ;;  %p2100_p9 = pnand %p2099_p3, %p2093_p2 }
  0x81   : > { %1145 = vmatpush2.bf16.msra.mxu1 %v1859_v43  ;;  %1105 = vmatprep.subr.bf16.mxu0 %v1860_v44  ;;  %v1947_v43 = vld [vmem:[#allocation5 + $0x3f4] ss:$8 sps:$4 sm:$0xff]   ;;  %v1942_v44 = vld [vmem:[#allocation5 + $0x2f0] ss:$8 sps:$4 sm:$0xff]  }
  0x82   : > { %1146 = vmatprep.subr.bf16.mxu1 %v1862_v45  ;;  %v1945_v45 = vld [vmem:[#allocation5 + $0x3f0] ss:$8 sps:$4 sm:$0xff]  }
  0x84   : > { %1106 = vmatpush2.bf16.msra.mxu0 %v1864_v49  ;;  %v1951_v49 = vld [vmem:[#allocation5 + $0x3e0] ss:$8 sps:$4 sm:$0xff]  }
  0x85   : > { %1147 = vmatpush2.bf16.msra.mxu1 %v1865_v50  ;;  %1107 = vmatprep.subr.bf16.mxu0 %v1866_v52  ;;  %v1956_v50 = vld [vmem:[#allocation5 + $0x2d4] ss:$8 sps:$4 sm:$0xff]   ;;  %v1954_v52 = vld [vmem:[#allocation5 + $0x2d0] ss:$8 sps:$4 sm:$0xff]  }
  0x86   : > { %1148 = vmatprep.subr.bf16.mxu1 %v1868_v53  ;;  %v1957_v53 = vld [vmem:[#allocation5 + $0x3d0] ss:$8 sps:$4 sm:$0xff]  }
  0x88   : > { %1108 = vmatpush2.bf16.msra.mxu0 %v1870_v54  ;;  %v1962_v54 = vld [vmem:[#allocation5 + $0x2c4] ss:$8 sps:$4 sm:$0xff]  }
  0x89   : > { %1149 = vmatpush2.bf16.msra.mxu1 %v1871_v55  ;;  %1109 = vmatprep.subr.bf16.mxu0 %v1872_v56  ;;  %v1965_v55 = vld [vmem:[#allocation5 + $0x3c4] ss:$8 sps:$4 sm:$0xff]   ;;  %v1960_v56 = vld [vmem:[#allocation5 + $0x2c0] ss:$8 sps:$4 sm:$0xff]  }
  0x8a   : > { %1150 = vmatprep.subr.bf16.mxu1 %v1874_v57  ;;  %v1963_v57 = vld [vmem:[#allocation5 + $0x3c0] ss:$8 sps:$4 sm:$0xff]  }
  0x8c   : > { %1110 = vmatpush2.bf16.msra.mxu0 %v1876_v58  ;;  %v1968_v58 = vld [vmem:[#allocation5 + $0x2b4] ss:$8 sps:$4 sm:$0xff]  }
  0x8d   : > { %1151 = vmatpush2.bf16.msra.mxu1 %v1877_v59  ;;  %1111 = vmatprep.subr.bf16.mxu0 %v1878_v60  ;;  %v1971_v59 = vld [vmem:[#allocation5 + $0x3b4] ss:$8 sps:$4 sm:$0xff]   ;;  %v1966_v60 = vld [vmem:[#allocation5 + $0x2b0] ss:$8 sps:$4 sm:$0xff]  }
  0x8e   : > { %1152 = vmatprep.subr.bf16.mxu1 %v1880_v61  ;;  %v1969_v61 = vld [vmem:[#allocation5 + $0x3b0] ss:$8 sps:$4 sm:$0xff]  }
  0x90   : > { %1112 = vmatpush2.bf16.msra.mxu0 %v1882_v62  ;;  %v1974_v62 = vld [vmem:[#allocation5 + $0x2a4] ss:$8 sps:$4 sm:$0xff]  }
  0x91   : > { %1153 = vmatpush2.bf16.msra.mxu1 %v1883_v63  ;;  %1113 = vmatprep.subr.bf16.mxu0 %v1884_v0  ;;  %v1977_v63 = vld [vmem:[#allocation5 + $0x3a4] ss:$8 sps:$4 sm:$0xff]   ;;  %v1972_v0 = vld [vmem:[#allocation5 + $0x2a0] ss:$8 sps:$4 sm:$0xff]  }
  0x92   : > { %1154 = vmatprep.subr.bf16.mxu1 %v1886_v1  ;;  %v1975_v1 = vld [vmem:[#allocation5 + $0x3a0] ss:$8 sps:$4 sm:$0xff]  }
  0x94   : > { %1114 = vmatpush2.bf16.msra.mxu0 %v1888_v2  ;;  %v1980_v2 = vld [vmem:[#allocation5 + $0x294] ss:$8 sps:$4 sm:$0xff]  }
  0x95   : > { %1155 = vmatpush2.bf16.msra.mxu1 %v1889_v3  ;;  %1165 = vmatprep.subr.bf16.mxu0 %v1896_v4  ;;  %v1983_v3 = vld [vmem:[#allocation5 + $0x394] ss:$8 sps:$4 sm:$0xff]   ;;  %v1978_v4 = vld [vmem:[#allocation5 + $0x290] ss:$8 sps:$4 sm:$0xff]  }
  0x96   : > { %1206 = vmatprep.subr.bf16.mxu1 %v1899_v5  ;;  %v1981_v5 = vld [vmem:[#allocation5 + $0x390] ss:$8 sps:$4 sm:$0xff]  }
  0x97   : > { %1116 = vmatmul.mubr.bf16.vlgmr.msra.gmra.mxu0 %v1543_v6  ;;  %v1986_v6 = vld [vmem:[#allocation5 + $0x284] ss:$8 sps:$4 sm:$0xff]  }
  0x98   : > { %1157 = vmatmul.mubr.bf16.vlgmr.msra.gmra.mxu1 %v1545_v7  ;;  %1166 = vmatpush1.bf16.msra.mxu0 %v1894_v8  ;;  %v1989_v7 = vld [vmem:[#allocation5 + $0x384] ss:$8 sps:$4 sm:$0xff]   ;;  %v1984_v8 = vld [vmem:[#allocation5 + $0x280] ss:$8 sps:$4 sm:$0xff]  }
  0x99   : > { %1207 = vmatpush1.bf16.msra.mxu1 %v1897_v9  ;;  %1167 = vmatprep.subr.bf16.mxu0 %v1902_v10  ;;  %v1987_v9 = vld [vmem:[#allocation5 + $0x380] ss:$8 sps:$4 sm:$0xff]   ;;  %v1547_v10 = vcombine.low %v2333_v34, %v2333_v34 }
  0x9a   : > { %1208 = vmatprep.subr.bf16.mxu1 %v1905_v11  ;;  %1197 = vmatprep.mubr.bf16.mxu0 %v1548_v38  ;;  %v1549_v11 = vcombine.low %v2336_v35, %v2336_v35 }
  0x9b   : > { %1238 = vmatprep.mubr.bf16.mxu1 %v1550_v39  ;;  %v403_v39 = vld [vmem:[%s2396_s2] sm:$0x3] }
  0x9c   : > { %1168 = vmatpush1.bf16.msra.mxu0 %v1900_v12  ;;  %v1994_v12 = vld [vmem:[#allocation7 + $0x78] sm:$0xff]  }
  0x9d   : > { %1209 = vmatpush1.bf16.msra.mxu1 %v1903_v13  ;;  %1169 = vmatprep.subr.bf16.mxu0 %v1908_v14  ;;  %v1995_v13 = vld [vmem:[#allocation7 + $0x38] sm:$0xff]   ;;  %v1996_v14 = vld [vmem:[#allocation7 + $0x70] sm:$0xff]  }
  0x9e   : > { %1210 = vmatprep.subr.bf16.mxu1 %v1911_v15  ;;  %v1997_v15 = vld [vmem:[#allocation7 + $0x30] sm:$0xff]  }
  0xa0   : > { %1170 = vmatpush1.bf16.msra.mxu0 %v1906_v16  ;;  %v1998_v16 = vld [vmem:[#allocation7 + $0x68] sm:$0xff]  }
  0xa1   : > { %1211 = vmatpush1.bf16.msra.mxu1 %v1909_v17  ;;  %1171 = vmatprep.subr.bf16.mxu0 %v1914_v18  ;;  %v1999_v17 = vld [vmem:[#allocation7 + $0x28] sm:$0xff]   ;;  %v2000_v18 = vld [vmem:[#allocation7 + $0x60] sm:$0xff]  }
  0xa2   : > { %1212 = vmatprep.subr.bf16.mxu1 %v1917_v19  ;;  %v2001_v19 = vld [vmem:[#allocation7 + $0x20] sm:$0xff]  }
  0xa4   : > { %1172 = vmatpush1.bf16.msra.mxu0 %v1912_v20  ;;  %v2002_v20 = vld [vmem:[#allocation7 + $0x58] sm:$0xff]  }
  0xa5   : > { %1213 = vmatpush1.bf16.msra.mxu1 %v1915_v21  ;;  %1173 = vmatprep.subr.bf16.mxu0 %v1920_v22  ;;  %v2003_v21 = vld [vmem:[#allocation7 + $0x18] sm:$0xff]   ;;  %v2004_v22 = vld [vmem:[#allocation7 + $0x50] sm:$0xff]  }
  0xa6   : > { %1214 = vmatprep.subr.bf16.mxu1 %v1923_v23  ;;  %v2005_v23 = vld [vmem:[#allocation7 + $0x10] sm:$0xff]  }
  0xa8   : > { %1174 = vmatpush1.bf16.msra.mxu0 %v1918_v24  ;;  %v2006_v24 = vld [vmem:[#allocation7 + $0x48] sm:$0xff]  }
  0xa9   : > { %1215 = vmatpush1.bf16.msra.mxu1 %v1921_v25  ;;  %1175 = vmatprep.subr.bf16.mxu0 %v1926_v26  ;;  %v2007_v25 = vld [vmem:[#allocation7 + $0x8] sm:$0xff]   ;;  %v2008_v26 = vld [vmem:[#allocation7 + $0x40] sm:$0xff]  }
  0xaa   : > { %1216 = vmatprep.subr.bf16.mxu1 %v1929_v27  ;;  %v2009_v27 = vld [vmem:[#allocation7] sm:$0xff]  }
  0xac   : > { %1176 = vmatpush1.bf16.msra.mxu0 %v1924_v28 }
  0xad   : > { %1217 = vmatpush1.bf16.msra.mxu1 %v1927_v29  ;;  %1177 = vmatprep.subr.bf16.mxu0 %v1932_v30 }
  0xae   : > { %1218 = vmatprep.subr.bf16.mxu1 %v1935_v31 }
  0xb0   : > { %1178 = vmatpush1.bf16.msra.mxu0 %v1930_v32 }
  0xb1   : > { %1219 = vmatpush1.bf16.msra.mxu1 %v1933_v33  ;;  %1179 = vmatprep.subr.bf16.mxu0 %v1938_v36  ;;  %v405_v36 = vlaneseq }
  0xb2   : > { %1220 = vmatprep.subr.bf16.mxu1 %v1941_v37 }
  0xb3   : > { %v406_v37 = vshrl.u32 %v405_v36, 7 }
  0xb4   : > { %1180 = vmatpush1.bf16.msra.mxu0 %v1936_v40 }
  0xb5   : > { %1221 = vmatpush1.bf16.msra.mxu1 %v1939_v41  ;;  %1181 = vmatprep.subr.bf16.mxu0 %v1944_v42  ;;  %v407_v38 = vsub.s32 0, %v406_v37  ;;  %v411_v40 = vsub.s32 1, %v406_v37 }
  0xb6   : > { %1222 = vmatprep.subr.bf16.mxu1 %v1947_v43 }
  0xb7   : > { %v408_v41 = vrot.slane %v403_v39, %v407_v38  ;;  %v412_v42 = vrot.slane %v403_v39, %v411_v40 }
  0xb8   : > { %1182 = vmatpush2.bf16.msra.mxu0 %v1942_v44 }
  0xb9   : > { %1223 = vmatpush2.bf16.msra.mxu1 %v1945_v45  ;;  %1183 = vmatprep.subr.bf16.mxu0 %v1950_v46 }
  0xba   : > { %1224 = vmatprep.subr.bf16.mxu1 %v1953_v47 }
  0xbc   : > { %1184 = vmatpush2.bf16.msra.mxu0 %v1948_v48 }
  0xbd   : > { %1225 = vmatpush2.bf16.msra.mxu1 %v1951_v49  ;;  %1185 = vmatprep.subr.bf16.mxu0 %v1956_v50 }
  0xbe   : > { %1226 = vmatprep.subr.bf16.mxu1 %v1959_v51 }
  0xc0   : > { %1186 = vmatpush2.bf16.msra.mxu0 %v1954_v52 }
  0xc1   : > { %1227 = vmatpush2.bf16.msra.mxu1 %v1957_v53  ;;  %1187 = vmatprep.subr.bf16.mxu0 %v1962_v54 }
  0xc2   : > { %1228 = vmatprep.subr.bf16.mxu1 %v1965_v55 }
  0xc4   : > { %1188 = vmatpush2.bf16.msra.mxu0 %v1960_v56 }
  0xc5   : > { %1229 = vmatpush2.bf16.msra.mxu1 %v1963_v57  ;;  %1189 = vmatprep.subr.bf16.mxu0 %v1968_v58 }
  0xc6   : > { %1230 = vmatprep.subr.bf16.mxu1 %v1971_v59 }
  0xc8   : > { %1190 = vmatpush2.bf16.msra.mxu0 %v1966_v60 }
  0xc9   : > { %1231 = vmatpush2.bf16.msra.mxu1 %v1969_v61  ;;  %1191 = vmatprep.subr.bf16.mxu0 %v1974_v62 }
  0xca   : > { %1232 = vmatprep.subr.bf16.mxu1 %v1977_v63 }
  0xcc   : > { %1192 = vmatpush2.bf16.msra.mxu0 %v1972_v0  ;;  %v1679_v0 = vld [vmem:[%s2398_s4] ss:$0 sm:$0xff] }
  0xcd   : > { %1233 = vmatpush2.bf16.msra.mxu1 %v1975_v1  ;;  %1193 = vmatprep.subr.bf16.mxu0 %v1980_v2 }
  0xce   : > { %1234 = vmatprep.subr.bf16.mxu1 %v1983_v3 }
  0xd0   : > { %1194 = vmatpush2.bf16.msra.mxu0 %v1978_v4 }
  0xd1   : > { %1235 = vmatpush2.bf16.msra.mxu1 %v1981_v5  ;;  %1195 = vmatprep.subr.bf16.mxu0 %v1986_v6 }
  0xd2   : > { %1236 = vmatprep.subr.bf16.mxu1 %v1989_v7 }
  0xd4   : > { %1196 = vmatpush2.bf16.msra.mxu0 %v1984_v8 }
  0xd5   : > { %1237 = vmatpush2.bf16.msra.mxu1 %v1987_v9  ;;  %1701 = vmatprep.subr.bf16.mxu0 %v1994_v12 }
  0xd7   : > { %1198 = vmatmul.mubr.bf16.vlgmr.msra.gmra.mxu0 %v1547_v10 }
  0xd8   : > { %1239 = vmatmul.mubr.bf16.vlgmr.msra.gmra.mxu1 %v1549_v11  ;;  %1702 = vmatpush3.bf16.msra.mxu0 %v1995_v13 }
  0xd9   : > { %1703 = vmatprep.subr.bf16.mxu0 %v1996_v14 }
  0xdc   : > { %1704 = vmatpush3.bf16.msra.mxu0 %v1997_v15 }
  0xdd   : > { %1705 = vmatprep.subr.bf16.mxu0 %v1998_v16 }
  0xe0   : > { %1706 = vmatpush3.bf16.msra.mxu0 %v1999_v17 }
  0xe1   : > { %1707 = vmatprep.subr.bf16.mxu0 %v2000_v18 }
  0xe4   : > { %1708 = vmatpush3.bf16.msra.mxu0 %v2001_v19 }
  0xe5   : > { %1709 = vmatprep.subr.bf16.mxu0 %v2002_v20 }
  0xe8   : > { %1710 = vmatpush3.bf16.msra.mxu0 %v2003_v21 }
  0xe9   : > { %1711 = vmatprep.subr.bf16.mxu0 %v2004_v22 }
  0xec   : > { %1712 = vmatpush3.bf16.msra.mxu0 %v2005_v23 }
  0xed   : > { %1713 = vmatprep.subr.bf16.mxu0 %v2006_v24 }
  0xf0   : > { %1714 = vmatpush3.bf16.msra.mxu0 %v2007_v25 }
  0xf1   : > { %1715 = vmatprep.subr.bf16.mxu0 %v2008_v26 }
  0xf4   : > { %1716 = vmatpush3.bf16.msra.mxu0 %v2009_v27 }
 0x157   : > { %v1117_v28 = vpop.f32.mrf.mxu0 }
 0x158   : > { %v1158_v29 = vpop.f32.mrf.mxu1  ;;  %v1118_v43 = vadd.f32 %v1117_v28, %v408_v41 }
 0x159   : > { %v1119_v30 = vpop.f32.mrf.mxu0 }
 0x15a   : > { %v1160_v31 = vpop.f32.mrf.mxu1  ;;  %v1120_v44 = vadd.f32 %v1119_v30, %v412_v42  ;;  %v1159_v45 = vadd.f32 %v1158_v29, %v1118_v43 }
 0x15b   : > { %v1121_v32 = vpop.f32.mrf.mxu0 }
 0x15c   : > { %v1162_v33 = vpop.f32.mrf.mxu1  ;;  %v1161_v48 = vadd.f32 %v1160_v31, %v1120_v44 }
 0x15d   : > { %v1122_v34 = vpop.f32.mrf.mxu0 }
 0x15e   : > { %v1163_v35 = vpop.f32.mrf.mxu1 }
 0x197   : > { %v1199_v46 = vpop.f32.mrf.mxu0 }
 0x198   : > { %v1240_v47 = vpop.f32.mrf.mxu1  ;;  %v1200_v49 = vadd.f32 %v1199_v46, %v1159_v45 }
 0x199   : > { %v1201_v50 = vpop.f32.mrf.mxu0 }
 0x19a   : > { %v1242_v51 = vpop.f32.mrf.mxu1  ;;  %v1241_v52 = vadd.f32 %v1240_v47, %v1200_v49  ;;  %v1202_v53 = vadd.f32 %v1201_v50, %v1161_v48 }
 0x19b   : > { %v1203_v54 = vpop.f32.mrf.mxu0 }
 0x19c   : > { %v1244_v55 = vpop.f32.mrf.mxu1  ;;  %v1243_v56 = vadd.f32 %v1242_v51, %v1202_v53  ;;  %v1247_v57 = vmax.f32 %v1241_v52, 0.0 }
 0x19d   : > { %v1204_v58 = vpop.f32.mrf.mxu0 }
 0x19e   : > { %v1245_v59 = vpop.f32.mrf.mxu1  ;;  %v1248_v60 = vmax.f32 %v1243_v56, 0.0  ;;  %v1249_v62 = vpack.c.bf16 %v1247_v57, %v1247_v57 }
 0x1a0   : > { %v1250_v61 = vpack.c.bf16 %v1248_v60, %v1248_v60 }
 0x1a2   : > { %1418 = vmatprep.mubr.bf16.mxu0 %v1250_v61 }
 0x1a3   : > { %1419 = vmatmul.mubr.bf16.vlgmr.msra.gmra.mxu0 %v1249_v62 }
 0x263   : > { %v1717_v63 = vpop.f32.mrf.mxu0 }
 0x265   : > { %v1718_v1 = vpop.f32.mrf.mxu0 }
 0x266   : > { %v1719_v2 = vadd.f32 %v1718_v1, %v1717_v63 }
 0x267   : > { %v1720_v3 = vpop.f32.mrf.mxu0 }
 0x268   : > { %v1421_v4 = vadd.f32 %v1719_v2, %v1679_v0 }
 0x269   : > { %v1721_v5 = vpop.f32.mrf.mxu0 }
 0x26a   : > { %1426 = vst [vmem:[%s269_s6] sm:$0xff] %v1421_v4 }
 0x26b   : > { %2103 = shalt.err (!%p2100_p9)
}
 0x26c   : > { %s2104_s24 = scalar_lea.hbm %s2357_s9, 128  ;;  %s2108_s10 = scalar_lea.hbm %s2399_s5, 256 }
 0x26d   : > { %p2105_p13 = scmp.ne.s32.totalorder %s2357_s9, %s2104_s24  ;;  %p2109_p0 = scmp.lt.s32.totalorder %s2357_s9, %s2399_s5 }
 0x26e   : > { %p2110_p4 = scmp.lt.s32.totalorder %s2108_s10, %s2104_s24 }
 0x26f   : > { %p2106_p5 = pnand %p2105_p13, %p2415_p11 }
 0x270   : > { %p2111_p8 = por %p2110_p4, %p2109_p0 }
 0x271   : > { %p2107_p10 = pneg %p2106_p5 }
 0x273   : > { %p2112_p7 = pnand %p2111_p8, %p2107_p10 }
 0x275   : > { %2115 = shalt.err (!%p2112_p7)
}
 0x276   : > { %1733 = dma.vmem_to_hbm [thread:$0]  (%p2415_p11), %s1442_s7, 128, %s2357_s9, %s1428_s11  }
 0x277 PF: > { %s1453_s14 = sand.u32 1, %s2146_s18   ;;  %p2416_p1 = scmp.ne.s32.totalorder %s2405_s25, 0 }
 0x278   : > { %p2417_p2 = scmp.ge.s32.totalorder %s2158_s21, 2  ;;  %s1454_s6 = scalar_lea.sflag [#allocation4], %s1453_s14 }
 0x27a   : > { %p1747_p6 = pnand %p2417_p2, %p2416_p1 }
 0x27c   : > { %p1748_p12 = pneg %p1747_p6 }
 0x27e   : > { %2141 = dma.done.wait (%p1748_p12), %s1454_s6, 128  }
 0x27f   : > { %2143 = vsyncadd (%p1748_p12), %s1454_s6, 4294967168  ;;  %p19_p3 = scmp.ge.s32.totalorder %s2270_s17, 4   ;;  %s2418_s18 = smov %s2150_s19 }
 0x280   : > { %s2419_s19 = smov %s2154_s20  ;;  %s2420_s20 = smov %s2279_s28 }
 0x281   : > { %s2421_s21 = smov %s2270_s17  ;;  %21 = sbr.rel (!%p19_p3) target bundleno = 6 (0x6), region = 93 }
 0x286   :  { %1459 = vsyncpa [#allocation3], 1 }
 0x287   :  { %1461 = vsyncpa [#allocation3 + $0x1], 1 }
 0x288   :  { %1462 = vsyncpa [#allocation6], 1 }
 0x289   :  { %1463 = vsyncpa [#allocation4], 1 }
 0x28a   :  { %1465 = vsyncpa [#allocation4 + $0x1], 1 }

</bundles_post_ra>
